<compile_context>
chip_gen: v5e
topology: v5e:2x2
jax: 0.10.0
libtpu: 0.0.40
codegen_flags: <defaults>
</compile_context>

<pallas_src>
import functools

import jax
import jax.numpy as jnp
from jax.experimental import pallas as pl
from jax.experimental.pallas import tpu as pltpu

# Model hyperparameters (mirroring v2.py)
BLOCK_SIZE = 8          # block_size
N_EMBED = 32            # n_embed
VOCAB_SIZE = 65         # len(set(text)) -- tiny-shakespeare-like vocab, fixed here
LANE = 128
VOCAB_PAD = ((VOCAB_SIZE + LANE - 1) // LANE) * LANE   # 128 (lane-padded vocab)
K_PAD = 128             # contraction dim padded to one full MXU tile (>= V+P+1)

_NEG_BIG = -1.0e30      # "minus infinity" for padded vocab columns (finite -> no NaN)


def _bigram_kernel(vocab_size, seq_len, bias_row,
                   idx_ref, tgt_ref, w_ref, logits_ref, loss_ref):
    """Fused forward + cross-entropy for the bigram LM.

    idx_ref:    (BT, 1)     int32   token ids (row-major (b, t) flatten)
    tgt_ref:    (BT, 1)     int32   target ids
    w_ref:      (KP, VP)    f32     fused [tok@W.T ; pos@W.T ; bias ; 0-pad] table,
                                    KP = 128 (row-padded), VP = 128 (lane-padded);
                                    bias row's pad columns hold -1e30
    logits_ref: (BT, VP)    f32     lane-dense padded logits
    loss_ref:   (1, 1)      f32     SMEM scalar (mean cross-entropy)
    """
    BT = logits_ref.shape[0]
    KP = w_ref.shape[0]
    VP = w_ref.shape[1]

    idx = idx_ref[...]                                              # (BT, 1)
    tgt = tgt_ref[...]                                              # (BT, 1)

    # Combined one-hot: [token one-hot | position one-hot | bias column of 1s].
    col = jax.lax.broadcasted_iota(jnp.int32, (BT, KP), 1)          # (BT, KP)
    row = jax.lax.broadcasted_iota(jnp.int32, (BT, KP), 0)          # (BT, KP)
    if seq_len & (seq_len - 1) == 0:                                # static check
        pos = row & (seq_len - 1)                                   # row-major flatten
    else:
        pos = row % seq_len
    onehot = ((col == idx) | (col == vocab_size + pos) | (col == bias_row)
              ).astype(jnp.float32)                                 # (BT, KP)

    # Single aligned 128x128 MXU matmul -> lane-dense (BT, 128) logits.
    logits = jnp.dot(onehot, w_ref[...], preferred_element_type=jnp.float32)
    logits_ref[...] = logits

    # Cross-entropy (mean reduction, like F.cross_entropy).  Padded columns hold
    # ~-1e30 so exp(pad - m) underflows to exactly 0 and does not pollute the LSE.
    m = jnp.max(logits, axis=-1, keepdims=True)                     # (BT, 1)
    lse = m + jnp.log(jnp.sum(jnp.exp(logits - m), axis=-1, keepdims=True))
    col_l = jax.lax.broadcasted_iota(jnp.int32, (BT, VP), 1)        # (BT, VP)
    tgt_logit = jnp.sum(jnp.where(col_l == tgt, logits, 0.0),
                        axis=-1, keepdims=True)                     # (BT, 1)
    loss_ref[0, 0] = jnp.sum(lse - tgt_logit) * (1.0 / BT)          # scalar -> SMEM


def prepare_fused_weights(tok_table, pos_table, w_head, b_head):
    """One-time weight prep (static weights): fuse embeddings, lm_head and bias.

    Returns (K_PAD, VOCAB_PAD) = (128, 128) f32:
      rows [0, V)        : tok_table @ w_head.T
      rows [V, V+P)      : pos_table @ w_head.T
      row  V+P           : bias (pad columns set to -1e30 so pad logits ~ -inf)
      rows (V+P, K_PAD)  : zeros (contraction-dim padding)
    """
    V, _ = tok_table.shape
    P = pos_table.shape[0]
    assert V + P + 1 <= K_PAD and V <= VOCAB_PAD
    hp = jax.lax.Precision.HIGHEST
    tw = jnp.dot(tok_table, w_head.T, precision=hp)                 # (V, V)
    pw = jnp.dot(pos_table, w_head.T, precision=hp)                 # (P, V)
    w = jnp.zeros((K_PAD, VOCAB_PAD), jnp.float32)
    w = w.at[:V, :V].set(tw)
    w = w.at[V:V + P, :V].set(pw)
    w = w.at[V + P, :V].set(b_head)
    w = w.at[V + P, V:].set(_NEG_BIG)   # pin padded vocab columns to ~-inf
    return w


@functools.partial(jax.jit, static_argnames=("vocab_size", "n_pos"))
def bigram_forward(idx, targets, w_fused, *, vocab_size, n_pos):
    """Forward pass.

    Returns:
      logits_pad: (B, T, VOCAB_PAD) f32 — lane-padded logits; columns
                  [vocab_size, VOCAB_PAD) hold ~-1e30 sentinels (slice at the
                  point of consumption if real-vocab logits are needed).
      loss:       (1, 1) f32 — mean cross-entropy.
    """
    B, T = idx.shape
    BT = B * T
    KP, VP = w_fused.shape

    # Metadata-only reshapes (no extra XLA copies on the per-call path).
    idx_f = idx.reshape(BT, 1).astype(jnp.int32)
    tgt_f = targets.reshape(BT, 1).astype(jnp.int32)

    kernel = functools.partial(_bigram_kernel, vocab_size, T, vocab_size + n_pos)
    vmem = pl.BlockSpec(memory_space=pltpu.MemorySpace.VMEM)
    smem = pl.BlockSpec(memory_space=pltpu.MemorySpace.SMEM)

    logits_pad, loss = pl.pallas_call(
        kernel,
        out_shape=(
            jax.ShapeDtypeStruct((BT, VP), jnp.float32),   # lane-dense logits
            jax.ShapeDtypeStruct((1, 1), jnp.float32),     # scalar loss (SMEM)
        ),
        in_specs=[vmem, vmem, vmem],
        out_specs=(vmem, smem),
    )(idx_f, tgt_f, w_fused)

    return logits_pad.reshape(B, T, VP), loss


def _reference_forward(idx, targets, tok_table, pos_table, w_head, b_head):
    """Pure-JAX reference matching the PyTorch module semantics."""
    B, T = idx.shape
    token_emb = tok_table[idx]                      # (B, T, E)
    pos_emb = pos_table[jnp.arange(T)]              # (T, E)
    x = token_emb + pos_emb                         # (B, T, E)
    logits = jnp.einsum("bte,ve->btv", x, w_head,
                        precision=jax.lax.Precision.HIGHEST) + b_head
    lf = logits.reshape(B * T, -1)
    tf = targets.reshape(B * T)
    logp = jax.nn.log_softmax(lf, axis=-1)
    loss = -jnp.mean(logp[jnp.arange(B * T), tf])
    return logits, loss


if __name__ == "__main__":
    key = jax.random.PRNGKey(0)
    k_tok, k_pos, k_w, k_b, k_idx, k_tgt = jax.random.split(key, 6)

    B, T = 2, BLOCK_SIZE   # seq length == block_size (as in training)

    # Deterministic synthetic parameters (nn.Embedding ~ N(0,1); Linear ~ U)
    tok_table = jax.random.normal(k_tok, (VOCAB_SIZE, N_EMBED), jnp.float32)
    pos_table = jax.random.normal(k_pos, (BLOCK_SIZE, N_EMBED), jnp.float32)
    bound = 1.0 / (N_EMBED ** 0.5)
    w_head = jax.random.uniform(k_w, (VOCAB_SIZE, N_EMBED), jnp.float32,
                                -bound, bound)
    b_head = jax.random.uniform(k_b, (VOCAB_SIZE,), jnp.float32, -bound, bound)

    idx = jax.random.randint(k_idx, (B, T), 0, VOCAB_SIZE, jnp.int32)
    targets = jax.random.randint(k_tgt, (B, T), 0, VOCAB_SIZE, jnp.int32)

    # One-time fused-weight prep (hoisted out of the per-call path).
    w_fused = jax.block_until_ready(
        prepare_fused_weights(tok_table, pos_table, w_head, b_head))

    logits_pad, loss = bigram_forward(idx, targets, w_fused,
                                      vocab_size=VOCAB_SIZE, n_pos=BLOCK_SIZE)
    jax.block_until_ready((logits_pad, loss))

    # Slice the padded vocab lanes only here, at the point of consumption.
    logits = logits_pad[..., :VOCAB_SIZE]
    loss_scalar = loss[0, 0]

    ref_logits, ref_loss = _reference_forward(idx, targets, tok_table,
                                              pos_table, w_head, b_head)
    assert logits_pad.shape == (B, T, VOCAB_PAD)
    assert logits.shape == (B, T, VOCAB_SIZE)
    assert jnp.allclose(logits, ref_logits, atol=1e-4, rtol=1e-4), (
        float(jnp.max(jnp.abs(logits - ref_logits))))
    assert jnp.allclose(loss_scalar, ref_loss, atol=1e-4, rtol=1e-4), (
        float(loss_scalar), float(ref_loss))

    # TODO(synk): generate() (multinomial sampling loop) and the targets=None
    # branch are host-side control flow and are not part of the kernel; for a
    # real decode loop, fuse the steps into one pallas_call (or keep w_fused
    # resident via a cross-call future) to amortize weight DMA + dispatch.

    print("KERNEL_OK")
</pallas_src>

<mosaic_0001>
module attributes {stable_mosaic.version = 11 : i64} {
  func.func @_bigram_kernel(%arg0: memref<16x1xi32, #tpu.memory_space<vmem>>, %arg1: memref<16x1xi32, #tpu.memory_space<vmem>>, %arg2: memref<128x128xf32, #tpu.memory_space<vmem>>, %arg3: memref<16x128xf32, #tpu.memory_space<vmem>>, %arg4: memref<1x1xf32, #tpu.memory_space<smem>>) attributes {dimension_semantics = [], scalar_prefetch = 0 : i64, scratch_operands = 0 : i64, tpu.core_type = #tpu.core_type<tc>} {
    %c0 = arith.constant 0 : index
    %c0_0 = arith.constant 0 : index
    %0 = vector.load %arg0[%c0, %c0_0] : memref<16x1xi32, #tpu.memory_space<vmem>>, vector<16x1xi32>
    %c0_1 = arith.constant 0 : index
    %c0_2 = arith.constant 0 : index
    %1 = vector.load %arg1[%c0_1, %c0_2] : memref<16x1xi32, #tpu.memory_space<vmem>>, vector<16x1xi32>
    %2 = tpu.iota {dimensions = array<i32: 1>} : vector<16x128xi32>
    %3 = tpu.iota {dimensions = array<i32: 0>} : vector<16x128xi32>
    %c7_i32 = arith.constant 7 : i32
    %4 = vector.broadcast %c7_i32 : i32 to vector<16x128xi32>
    %5 = arith.andi %3, %4 : vector<16x128xi32>
    %6 = vector.broadcast %0 : vector<16x1xi32> to vector<16x128xi32>
    %7 = arith.cmpi eq, %2, %6 : vector<16x128xi32>
    %c65_i32 = arith.constant 65 : i32
    %8 = vector.broadcast %c65_i32 : i32 to vector<16x128xi32>
    %9 = arith.addi %8, %5 : vector<16x128xi32>
    %10 = arith.cmpi eq, %2, %9 : vector<16x128xi32>
    %11 = arith.ori %7, %10 : vector<16x128xi1>
    %c73_i32 = arith.constant 73 : i32
    %12 = vector.broadcast %c73_i32 : i32 to vector<16x128xi32>
    %13 = arith.cmpi eq, %2, %12 : vector<16x128xi32>
    %14 = arith.ori %11, %13 : vector<16x128xi1>
    %15 = arith.extui %14 : vector<16x128xi1> to vector<16x128xi32>
    %16 = arith.sitofp %15 : vector<16x128xi32> to vector<16x128xf32>
    %c0_3 = arith.constant 0 : index
    %c0_4 = arith.constant 0 : index
    %17 = vector.load %arg2[%c0_3, %c0_4] : memref<128x128xf32, #tpu.memory_space<vmem>>, vector<128x128xf32>
    %cst = arith.constant dense<0.000000e+00> : vector<16x128xf32>
    %18 = tpu.matmul %16, %17, %cst {dimension_numbers = #tpu.dot_dimension_numbers<[1], [0], [0], [1], [0, 0, 1, 1], [], []>} : vector<16x128xf32>, vector<128x128xf32>, vector<16x128xf32> -> vector<16x128xf32>
    %c0_5 = arith.constant 0 : index
    %c0_6 = arith.constant 0 : index
    %19 = vector.load %arg3[%c0_5, %c0_6] : memref<16x128xf32, #tpu.memory_space<vmem>>, vector<16x128xf32>
    tpu.vector_store %arg3[%c0_5, %c0_6], %18 {strides = array<i32>} : memref<16x128xf32, #tpu.memory_space<vmem>>, vector<16x128xf32>,
    %cst_7 = arith.constant dense<0xFF800000> : vector<16xf32>
    %20 = vector.multi_reduction <maximumf>, %18, %cst_7 [1] : vector<16x128xf32> to vector<16xf32>
    %21 = vector.shape_cast %20 : vector<16xf32> to vector<16x1xf32>
    %22 = vector.broadcast %21 : vector<16x1xf32> to vector<16x128xf32>
    %23 = arith.subf %18, %22 : vector<16x128xf32>
    %24 = math.exp %23 : vector<16x128xf32>
    %cst_8 = arith.constant dense<0.000000e+00> : vector<16xf32>
    %25 = vector.multi_reduction <add>, %24, %cst_8 [1] : vector<16x128xf32> to vector<16xf32>
    %26 = vector.shape_cast %25 : vector<16xf32> to vector<16x1xf32>
    %27 = math.log %26 : vector<16x1xf32>
    %28 = arith.addf %21, %27 : vector<16x1xf32>
    %29 = tpu.iota {dimensions = array<i32: 1>} : vector<16x128xi32>
    %30 = vector.broadcast %1 : vector<16x1xi32> to vector<16x128xi32>
    %31 = arith.cmpi eq, %29, %30 : vector<16x128xi32>
    %cst_9 = arith.constant 0.000000e+00 : f32
    %32 = vector.broadcast %cst_9 : f32 to vector<16x128xf32>
    %33 = arith.select %31, %18, %32 : vector<16x128xi1>, vector<16x128xf32>
    %cst_10 = arith.constant dense<0.000000e+00> : vector<16xf32>
    %34 = vector.multi_reduction <add>, %33, %cst_10 [1] : vector<16x128xf32> to vector<16xf32>
    %35 = vector.shape_cast %34 : vector<16xf32> to vector<16x1xf32>
    %36 = arith.subf %28, %35 : vector<16x1xf32>
    %37 = vector.shape_cast %36 : vector<16x1xf32> to vector<1x16x1xf32>
    %cst_11 = arith.constant dense<0.000000e+00> : vector<1xf32>
    %38 = vector.multi_reduction <add>, %37, %cst_11 [1, 2] : vector<1x16x1xf32> to vector<1xf32>
    %39 = vector.shape_cast %38 : vector<1xf32> to vector<1x1x1xf32>
    %40 = vector.extract %39[0, 0, 0] : f32 from vector<1x1x1xf32>
    %cst_12 = arith.constant 6.250000e-02 : f32
    %41 = arith.mulf %40, %cst_12 : f32
    %c0_13 = arith.constant 0 : index
    %c0_14 = arith.constant 0 : index
    %42 = memref.load %arg4[%c0_13, %c0_14] : memref<1x1xf32, #tpu.memory_space<smem>>
    memref.store %41, %arg4[%c0_13, %c0_14] : memref<1x1xf32, #tpu.memory_space<smem>>
    return
  }
}

</mosaic_0001>

<bundles_post_ra>
// kernel: bigram_forward.1
= control target key start
LH: loop header
LB: loop body
LE: loop exit
PB: predicated region body
PF: predicated region fallthrough
CT: control target
= control target key end

     0   :  { %10 = vsyncpa [#allocation3], 0  ;;  %s357_s0 = inlined_call_operand.vmem [shape: s32[16,1], index: 0, kind: input, shape index: {}]   ;;  %s358_s1 = inlined_call_operand.vmem [shape: s32[16,1], index: 1, kind: input, shape index: {}]   ;;  %s359_s2 = inlined_call_operand.hbm [shape: f32[128,128], index: 2, kind: input, shape index: {}]   ;;  %s360_s3 = inlined_call_operand.hbm [shape: f32[16,128], index: 3, kind: output, shape index: {0}]   ;;  %s361_s4 = inlined_call_operand.hbm [shape: f32[1,1], index: 4, kind: output, shape index: {1}]  }
   0x1   :  { %11 = vsyncpa [#allocation4], 0 }
   0x2   :  { %12 = vsyncpa [#allocation5], 0  ;;  %s21_s17 = sshll.u32 %s359_s2, 4  ;;  %s298_s18 = smov [#allocation2]   ;;  %s22_s17 = int_to_ptr.hbm [resolvable:$true] %s21_s17 }
   0x3   :  { %s23_s19 = sshll.u32 %s298_s18, 4  ;;  %s299_s20 = smov 128   ;;  %s24_s19 = int_to_ptr.vmem [resolvable:$true] %s23_s19 }
   0x4   :  { %s300_s21 = smov 8  }
   0x5   :  { %29 = dma.hbm_to_vmem [thread:$0]  %s22_s17, 2048, %s24_s19, [#allocation3], %s299_s20, %s299_s20, %s300_s21  }
   0x6   :  { %292 = dma.done.wait [#allocation3], 2048  }
   0x7   :  { %293 = vsyncadd [#allocation3], 4294965248  ;;  %v301_v0 = vmov 0   ;;  %v34_v1 = vld [vmem:[%s357_s0] sm:$0xff]  ;;  %v81_v2 = vld [vmem:[#allocation2 + $0x78] sm:$0xff]  ;;  %v38_v20 = vlaneseq  ;;  %v302_v30 = vmov 1.0  }
   0x8   :  { %222 = vset.pattern.permute.xlu0 %v301_v0  ;;  %223 = vset.pattern.permute.xlu2 %v301_v0  ;;  %v80_v3 = vld [vmem:[#allocation2 + $0x70] sm:$0xff]  ;;  %v79_v4 = vld [vmem:[#allocation2 + $0x68] sm:$0xff]  ;;  %v78_v5 = vld [vmem:[#allocation2 + $0x60] sm:$0xff]  ;;  %vm143_vm11 = vcmask 7168   ;;  %s165_s5 = sshll.u32 %s360_s3, 4  ;;  %s177_s8 = sshll.u32 %s361_s4, 4  ;;  %s166_s5 = int_to_ptr.hbm [resolvable:$true] %s165_s5  ;;  %s178_s8 = int_to_ptr.hbm [resolvable:$true] %s177_s8 }
   0x9   :  { %46 = vperm.xlu0 %222, %v34_v1   ;;  %82 = vmatpush.msra.mxu0 %v81_v2  ;;  %v35_v6 = vld [vmem:[%s357_s0 + $0x8] sm:$0xff]  ;;  %v77_v7 = vld [vmem:[#allocation2 + $0x58] sm:$0xff]  ;;  %v76_v8 = vld [vmem:[#allocation2 + $0x50] sm:$0xff]  ;;  %v41_v22 = vshrl.u32 %v38_v20, 7  ;;  %v39_v24 = vand.u32 127, %v38_v20  ;;  %s304_s10 = smov [#allocation7]  }
   0xa   :  { %197 = vmatpush.msra.mxu1 %v81_v2  ;;  %v75_v9 = vld [vmem:[#allocation2 + $0x48] sm:$0xff]  ;;  %v74_v10 = vld [vmem:[#allocation2 + $0x40] sm:$0xff]  ;;  %v73_v11 = vld [vmem:[#allocation2 + $0x38] sm:$0xff] }
   0xb   :  { %83 = vmatpush.msra.mxu0 %v80_v3  ;;  %v72_v12 = vld [vmem:[#allocation2 + $0x30] sm:$0xff]  ;;  %v71_v13 = vld [vmem:[#allocation2 + $0x28] sm:$0xff]  ;;  %v70_v14 = vld [vmem:[#allocation2 + $0x20] sm:$0xff]  ;;  %v43_v23 = vand.u32 7, %v41_v22  ;;  %v42_v26 = vadd.s32 8, %v41_v22  ;;  %vm59_vm1 = vcmp.eq.s32.totalorder %v39_v24, 73 }
   0xc   :  { %198 = vmatpush.msra.mxu1 %v80_v3  ;;  %v69_v15 = vld [vmem:[#allocation2 + $0x18] sm:$0xff]  ;;  %v68_v16 = vld [vmem:[#allocation2 + $0x10] sm:$0xff]  ;;  %v67_v17 = vld [vmem:[#allocation2 + $0x8] sm:$0xff] }
   0xd   :  { %84 = vmatpush.msra.mxu0 %v79_v4  ;;  %v66_v18 = vld [vmem:[#allocation2] sm:$0xff]  ;;  %v37_v21 = vld [vmem:[%s358_s1 + $0x8] sm:$0xff]  ;;  %v53_v25 = vadd.s32 65, %v43_v23  ;;  %v44_v27 = vand.u32 7, %v42_v26 }
   0xe   :  { %199 = vmatpush.msra.mxu1 %v79_v4  ;;  %v36_v19 = vld [vmem:[%s358_s1] sm:$0xff]  ;;  %s303_s1 = smov [#allocation6]  }
   0xf   :  { %85 = vmatpush.msra.mxu0 %v78_v5  ;;  %128 = vperm.xlu2 %223, %v36_v19   ;;  %vm55_vm0 = vcmp.eq.s32.totalorder %v39_v24, %v53_v25  ;;  %v54_v29 = vadd.s32 65, %v44_v27  ;;  %s163_s28 = sshll.u32 %s303_s1, 4  ;;  %s164_s28 = int_to_ptr.vmem [resolvable:$true] %s163_s28 }
  0x10   :  { %200 = vmatpush.msra.mxu1 %v78_v5 }
  0x11   :  { %49 = vperm.xlu0 %222, %v35_v6   ;;  %86 = vmatpush.msra.mxu0 %v77_v7  ;;  %vm56_vm5 = vcmp.eq.s32.totalorder %v39_v24, %v54_v29 }
  0x12   :  { %201 = vmatpush.msra.mxu1 %v77_v7 }
  0x13   :  { %87 = vmatpush.msra.mxu0 %v76_v8 }
  0x14   :  { %202 = vmatpush.msra.mxu1 %v76_v8 }
  0x15   :  { %88 = vmatpush.msra.mxu0 %v75_v9 }
  0x16   :  { %203 = vmatpush.msra.mxu1 %v75_v9 }
  0x17   :  { %89 = vmatpush.msra.mxu0 %v74_v10  ;;  %131 = vperm.xlu2 %223, %v37_v21  }
  0x18   :  { %204 = vmatpush.msra.mxu1 %v74_v10 }
  0x19   :  { %90 = vmatpush.msra.mxu0 %v73_v11 }
  0x1a   :  { %205 = vmatpush.msra.mxu1 %v73_v11 }
  0x1b   :  { %91 = vmatpush.msra.mxu0 %v72_v12 }
  0x1c   :  { %206 = vmatpush.msra.mxu1 %v72_v12 }
  0x1d   :  { %92 = vmatpush.msra.mxu0 %v71_v13 }
  0x1e   :  { %207 = vmatpush.msra.mxu1 %v71_v13 }
  0x1f   :  { %93 = vmatpush.msra.mxu0 %v70_v14 }
  0x20   :  { %208 = vmatpush.msra.mxu1 %v70_v14 }
  0x21   :  { %94 = vmatpush.msra.mxu0 %v69_v15 }
  0x22   :  { %209 = vmatpush.msra.mxu1 %v69_v15 }
  0x23   :  { %95 = vmatpush.msra.mxu0 %v68_v16 }
  0x24   :  { %210 = vmatpush.msra.mxu1 %v68_v16 }
  0x25   :  { %96 = vmatpush.msra.mxu0 %v67_v17 }
  0x26   :  { %211 = vmatpush.msra.mxu1 %v67_v17 }
  0x27   :  { %97 = vmatpush.msra.mxu0 %v66_v18 }
  0x28   :  { %212 = vmatpush.msra.mxu1 %v66_v18 }
  0x69   :  { %v129_v32 = vpop.permute.xlu2 %128 }
  0x6a   :  { %vm133_vm9 = vcmp.eq.s32.totalorder %v39_v24, %v129_v32 }
  0x71   :  { %v132_v44 = vpop.permute.xlu2 %131 }
  0x72   :  { %vm134_vm10 = vcmp.eq.s32.totalorder %v39_v24, %v132_v44 }
  0x7b   :  { %v47_v28 = vpop.permute.xlu0 %46 }
  0x7c   :  { %vm51_vm2 = vcmp.eq.s32.totalorder %v39_v24, %v47_v28 }
  0x7d   :  { %vm57_vm3 = vmor %vm51_vm2, %vm55_vm0 }
  0x7e   :  { %vm60_vm4 = vmor %vm57_vm3, %vm59_vm1 }
  0x7f   :  { %195 = vmatmul.msk.f32.vlgmr.msra.gmra.mxu0 %vm60_vm4, %v302_v30 }
  0x83   :  { %v50_v31 = vpop.permute.xlu0 %49 }
  0x84   :  { %vm52_vm6 = vcmp.eq.s32.totalorder %v39_v24, %v50_v31 }
  0x85   :  { %vm58_vm7 = vmor %vm52_vm6, %vm56_vm5 }
  0x86   :  { %vm61_vm8 = vmor %vm58_vm7, %vm59_vm1 }
  0x87   :  { %196 = vmatmul.msk.f32.vlgmr.msra.gmra.mxu1 %vm61_vm8, %v302_v30 }
  0xfc   :  { %v99_v33 = vpop.f32.mrf.mxu0 }
  0xfd   :  { %105 = vst [vmem:[#allocation6] sm:$0xff] %v99_v33  ;;  %107 = vmax.xlane.f32.xlu1 %v99_v33  ;;  %v135_v34 = vsel %vm133_vm9, %v99_v33, 0.0 }
  0xfe   :  { %137 = vadd.xlane.f32.xlu2 %v135_v34 }
 0x104   :  { %v102_v35 = vpop.f32.mrf.mxu1 }
 0x105   :  { %106 = vst [vmem:[#allocation6 + $0x8] sm:$0xff] %v102_v35  ;;  %109 = vmax.xlane.f32.xlu1 %v102_v35  ;;  %v136_v45 = vsel %vm134_vm10, %v102_v35, 0.0 }
 0x106   :  { %171 = dma.vmem_to_hbm [thread:$0]  %s164_s28, 256, %s166_s5, [#allocation4], %s299_s20, %s299_s20, %s300_s21  }
 0x170   :  { %v108_v36 = vpop.xlane.xlu1 %107 }
 0x171   :  { %v111_v37 = vsub.f32 %v99_v33, %v108_v36  ;;  %v138_v53 = vpop.xlane.xlu2 %137 }
 0x173   :  { %v113_v38 = vmul.f32 1.442695, %v111_v37 }
 0x175   :  { %224 = vpow2.f32 %v113_v38 }
 0x178   :  { %v110_v39 = vpop.xlane.xlu1 %109 }
 0x179   :  { %v112_v40 = vsub.f32 %v102_v35, %v110_v39 }
 0x17b   :  { %v225_v41 = vpop.eup %224  ;;  %v115_v42 = vmul.f32 1.442695, %v112_v40 }
 0x17c   :  { %117 = vadd.xlane.f32.xlu0 %v225_v41 }
 0x17d   :  { %226 = vpow2.f32 %v115_v42 }
 0x183   :  { %v227_v43 = vpop.eup %226 }
 0x184   :  { %119 = vadd.xlane.f32.xlu1 %v227_v43 }
 0x18c   :  { %139 = vadd.xlane.f32.xlu1 %v136_v45 }
 0x1ef   :  { %v118_v46 = vpop.xlane.xlu0 %117 }
 0x1f0   :  { %228 = vlog2.f32 %v118_v46 }
 0x1f6   :  { %v229_v47 = vpop.eup %228 }
 0x1f7   :  { %v120_v48 = vpop.xlane.xlu1 %119  ;;  %v122_v49 = vmul.f32 0.6931472, %v229_v47 }
 0x1f8   :  { %230 = vlog2.f32 %v120_v48 }
 0x1f9   :  { %v125_v50 = vadd.f32 %v122_v49, %v108_v36 }
 0x1fb   :  { %v141_v55 = vsub.f32 %v125_v50, %v138_v53 }
 0x1fd   :  { %v144_v58 = vsel %vm143_vm11, %v141_v55, 0.0 }
 0x1fe   :  { %v231_v51 = vpop.eup %230 }
 0x1ff   :  { %v124_v52 = vmul.f32 0.6931472, %v231_v51  ;;  %v140_v56 = vpop.xlane.xlu1 %139 }
 0x201   :  { %v126_v54 = vadd.f32 %v124_v52, %v110_v39 }
 0x203   :  { %v142_v57 = vsub.f32 %v126_v54, %v140_v56 }
 0x205   :  { %v145_v59 = vsel %vm143_vm11, %v142_v57, 0.0 }
 0x206   :  { %v146_v60 = vadd.f32 %v145_v59, %v144_v58 }
 0x208   :  { %147 = vadd.xlane.f32.xlu1 %v146_v60 }
 0x27b   :  { %v148_v61 = vpop.xlane.xlu1 %147 }
 0x27c   :  { %v149_v62 = vrot.slane %v148_v61, 4 }
 0x27e   :  { %v150_v63 = vadd.f32 %v149_v62, %v148_v61 }
 0x280   :  { %v151_v0 = vrot.slane %v150_v63, 2 }
 0x282   :  { %v152_v1 = vadd.f32 %v151_v0, %v150_v63 }
 0x284   :  { %v153_v2 = vrot.slane %v152_v1, 1 }
 0x286   :  { %v154_v3 = vadd.f32 %v153_v2, %v152_v1 }
 0x288   :  { %213 = vpush %v154_v3 }
 0x2b9   :  { %s214_s9 = spop %213 }
 0x2ba   :  { %s156_s3 = smul.f32 0.0625, %s214_s9 }
 0x2bc   :  { %158 = sst [smem:[#allocation7]] %s156_s3 }
 0x2bd   :  { %180 = dma.smem_to_hbm %s304_s10, 16, %s178_s8, [#allocation5]  }
 0x2be   :  { %294 = dma.done.wait [#allocation4], 256  }
 0x2bf   :  { %295 = vsyncadd [#allocation4], 4294967040 }
 0x2c0   :  { %296 = dma.done.wait [#allocation5], 16  }
 0x2c1   :  { %297 = vsyncadd [#allocation5], 4294967280 }
 0x2c2   :  { %189 = sfence }
 0x2c3   :  { %190 = vsyncpa [#allocation3], 1 }
 0x2c4   :  { %191 = vsyncpa [#allocation4], 1 }
 0x2c5   :  { %192 = vsyncpa [#allocation5], 1 }

</bundles_post_ra>
